<compile_context>
chip_gen: v5e
topology: v5e:2x2
jax: 0.10.0
libtpu: 0.0.40
codegen_flags: <defaults>
</compile_context>

<pallas_src>
import jax
import jax.numpy as jnp
from jax.experimental import pallas as pl
from jax.experimental.pallas import tpu as pltpu


def _attention_gate_kernel(x_ref, g_ref, w1x_ref, w1g_ref, w2_ref, o_ref):
    # x_ref: (1, Cx, T), g_ref: (1, Cg, T)
    # w1x_ref: (Cout, Cx), w1g_ref: (Cout, Cg), w2_ref: (Cout, Cout)
    x = x_ref[0]                      # (Cx, T), native dtype
    g = g_ref[0]                      # (Cg, T)

    # 1x1 conv over concat([x, g]):  h = W1x @ x + W1g @ g   (f32 accumulate)
    h = jnp.dot(w1x_ref[...], x, preferred_element_type=jnp.float32)
    h = h + jnp.dot(w1g_ref[...], g, preferred_element_type=jnp.float32)
    h = jnp.maximum(h, 0.0)           # ReLU, f32

    # attn = sigmoid(W2 @ h); keep the matmul LHS/RHS in the input dtype so
    # bf16 inputs use the fast MXU path (f32 accumulation either way).
    logits = jnp.dot(w2_ref[...], h.astype(x.dtype),
                     preferred_element_type=jnp.float32)
    attn = pl.reciprocal(1.0 + jnp.exp(-logits))   # exp + recip -> EUP slot

    # out = res * attn   (res = x)
    o_ref[0] = (x * attn).astype(o_ref.dtype)


def _attention_gate_kernel_c1(x_ref, g_ref, w1x_ref, w1g_ref, w2_ref, o_ref):
    # Fast path for out_ch == 1: the second 1x1 conv is a single scalar scale,
    # so skip the degenerate (1,1)@(1,T) MXU dot.
    x = x_ref[0]                      # (Cx, T)
    g = g_ref[0]                      # (Cg, T)

    h = jnp.dot(w1x_ref[...], x, preferred_element_type=jnp.float32)   # (1, T)
    h = h + jnp.dot(w1g_ref[...], g, preferred_element_type=jnp.float32)
    h = jnp.maximum(h, 0.0)

    logits = h * w2_ref[...].astype(jnp.float32)   # (1,1) broadcast -> (1, T)
    attn = pl.reciprocal(1.0 + jnp.exp(-logits))

    o_ref[0] = (x * attn).astype(o_ref.dtype)      # broadcasts over channels


def _round_up(x, m):
    return -(-x // m) * m


def _round_down(x, m):
    return (x // m) * m


def attention_gate(x_nchw, g_nchw, w_x_g, w_attn, *, tile_hw=None):
    """Forward pass of AttentionGate(concat=True).

    x_nchw : (N, Cx, H, W)
    g_nchw : (N, Cg, H, W)
    w_x_g  : (Cout, Cx + Cg, 1, 1)   torch Conv2d weight layout (bias=False)
    w_attn : (Cout, Cout, 1, 1)      torch Conv2d weight layout (bias=False)
    returns: (N, Cx, H, W)
    """
    N, Cx, H, W = x_nchw.shape
    Cg = g_nchw.shape[1]
    Cout = w_x_g.shape[0]
    assert w_x_g.shape[1] == Cx + Cg
    assert Cout == Cx or Cout == 1, \
        "res * attn broadcast requires out_ch == in_ch_x (or out_ch == 1)"

    HW = H * W
    LANE = 128
    itemsize = jnp.dtype(x_nchw.dtype).itemsize

    # ---- generation-aware VMEM budget (v7x: 64 MiB/TC; v5e/v6e: 128 MiB) ----
    try:
        vmem_cap = int(pltpu.get_tpu_info().vmem_capacity_bytes)
    except Exception:
        vmem_cap = 64 * 1024 * 1024
    vmem_budget = min(vmem_cap // 2, 40 * 1024 * 1024)

    # VMEM bytes needed per spatial lane: double-buffered x/g/out tiles plus
    # f32 h/logits/attn working values (sublane-padded to >= 8 rows).
    bytes_per_lane = 2 * (2 * Cx + Cg) * itemsize + 4 * 4 * max(Cout, 8)
    max_tile = max(LANE, _round_down(vmem_budget // bytes_per_lane, LANE))

    if tile_hw is None:
        # Amortize the ~0.35us per-grid-step overhead: target >= ~6 MiB of
        # HBM I/O per step (matters most at v7x's ~3.2 TB/s).
        target_step_bytes = 6 * 1024 * 1024
        tile_hw = max(LANE, target_step_bytes // ((2 * Cx + Cg) * itemsize))
    tile_hw = min(int(tile_hw), max_tile)

    # Keep enough grid steps that both TensorCores (v7x megacore) have work.
    min_total_steps = 8
    spatial_steps = -(-min_total_steps // max(N, 1))
    if spatial_steps > 1:
        cap = max(LANE, _round_up(-(-HW // spatial_steps), LANE))
        tile_hw = min(tile_hw, cap)

    # (8,128) block rule: last dim must be a multiple of 128 OR the full extent.
    if tile_hw >= HW:
        tile_hw = HW
    else:
        tile_hw = max(LANE, _round_down(tile_hw, LANE))

    n_spatial = -(-HW // tile_hw)   # cdiv; last block may be partial (masked)

    # NCHW -> (N, C, H*W): a pure reshape, no transpose / pad / extra HBM pass.
    x3d = x_nchw.reshape(N, Cx, HW)
    g3d = g_nchw.reshape(N, Cg, HW)

    # Conv2d weight (Cout, Cin, 1, 1) -> left-multiply matrices (Cout, Cin)
    w1 = w_x_g[:, :, 0, 0]        # (Cout, Cx + Cg)
    w1x = w1[:, :Cx]              # (Cout, Cx)
    w1g = w1[:, Cx:]              # (Cout, Cg)
    w2 = w_attn[:, :, 0, 0]       # (Cout, Cout)

    kernel = _attention_gate_kernel_c1 if Cout == 1 else _attention_gate_kernel

    # vmem limit: actual use is <= vmem_budget by construction; add headroom,
    # stay well below v7x's 64 MiB per TensorCore.
    vmem_limit = int(min(vmem_budget + 8 * 1024 * 1024, 48 * 1024 * 1024))

    grid = (N, n_spatial)

    out3d = pl.pallas_call(
        kernel,
        out_shape=jax.ShapeDtypeStruct((N, Cx, HW), x_nchw.dtype),
        grid_spec=pltpu.PrefetchScalarGridSpec(
            num_scalar_prefetch=0,
            grid=grid,
            in_specs=[
                pl.BlockSpec((1, Cx, tile_hw), lambda n, s: (n, 0, s)),
                pl.BlockSpec((1, Cg, tile_hw), lambda n, s: (n, 0, s)),
                # Weights are tiny and resident: block index is (0, 0) every
                # step, so no per-iteration weight DMA.
                pl.BlockSpec((Cout, Cx), lambda n, s: (0, 0)),
                pl.BlockSpec((Cout, Cg), lambda n, s: (0, 0)),
                pl.BlockSpec((Cout, Cout), lambda n, s: (0, 0)),
            ],
            out_specs=pl.BlockSpec((1, Cx, tile_hw), lambda n, s: (n, 0, s)),
        ),
        compiler_params=pltpu.CompilerParams(
            dimension_semantics=("parallel", "parallel"),
            vmem_limit_bytes=vmem_limit,
        ),
        cost_estimate=pl.CostEstimate(
            flops=2 * N * HW * (Cx + Cg + Cout) * Cout + N * HW * Cx,
            transcendentals=2 * N * HW * Cout,                 # exp + recip
            bytes_accessed=N * HW * (2 * Cx + Cg) * itemsize
                           + (Cout * (Cx + Cg) + Cout * Cout) * itemsize,
        ),
    )(x3d, g3d, w1x, w1g, w2)

    # Pure reshape back to NCHW; no slice (ragged tail never written).
    return out3d.reshape(N, Cx, H, W)


def _reference(x, g, w_x_g, w_attn):
    """Plain-JAX reference mirroring the torch module (for verification)."""
    xg = jnp.concatenate([x, g], axis=1)                       # (N, Cx+Cg, H, W)
    w1 = w_x_g[:, :, 0, 0]                                     # (Cout, Cin)
    h = jnp.einsum("ncij,oc->noij", xg, w1)
    h = jnp.maximum(h, 0.0)
    w2 = w_attn[:, :, 0, 0]
    a = jax.nn.sigmoid(jnp.einsum("ncij,oc->noij", h, w2))
    return x * a


def _run_case(key, N, Cx, Cg, Cout, H, W, dtype=jnp.float32):
    kx, kg, kw1, kw2 = jax.random.split(key, 4)
    x = jax.random.normal(kx, (N, Cx, H, W), dtype=dtype)
    g = jax.random.normal(kg, (N, Cg, H, W), dtype=dtype)
    w_x_g = 0.1 * jax.random.normal(kw1, (Cout, Cx + Cg, 1, 1), dtype=dtype)
    w_attn = 0.1 * jax.random.normal(kw2, (Cout, Cout, 1, 1), dtype=dtype)

    out = attention_gate(x, g, w_x_g, w_attn)
    out = jax.block_until_ready(out)

    ref = _reference(x, g, w_x_g, w_attn)
    assert out.shape == (N, Cx, H, W)
    assert jnp.allclose(out, ref, atol=1e-5, rtol=1e-5), \
        f"mismatch vs reference (max abs err {jnp.max(jnp.abs(out - ref))})"


if __name__ == "__main__":
    key = jax.random.PRNGKey(0)
    k1, k2, k3 = jax.random.split(key, 3)

    # Standard configuration: in_ch_x == out_ch, H*W a multiple of 128.
    _run_case(k1, N=2, Cx=8, Cg=16, Cout=8, H=16, W=16)

    # Ragged spatial size: exercises the padless partial-last-block path.
    _run_case(k2, N=2, Cx=8, Cg=16, Cout=8, H=13, W=11)

    # out_ch == 1: exercises the scalar-attention fast-path kernel.
    _run_case(k3, N=2, Cx=8, Cg=16, Cout=1, H=16, W=16)

    print("KERNEL_OK")
</pallas_src>

<mosaic_0001>
module attributes {stable_mosaic.version = 11 : i64} {
  func.func @_attention_gate_kernel(%arg0: i32, %arg1: i32, %arg2: memref<1x8x128xf32, #tpu.memory_space<vmem>>, %arg3: memref<1x16x128xf32, #tpu.memory_space<vmem>>, %arg4: memref<8x8xf32, #tpu.memory_space<vmem>>, %arg5: memref<8x16xf32, #tpu.memory_space<vmem>>, %arg6: memref<8x8xf32, #tpu.memory_space<vmem>>, %arg7: memref<1x8x128xf32, #tpu.memory_space<vmem>>) attributes {dimension_semantics = [#tpu.dimension_semantics<parallel>, #tpu.dimension_semantics<parallel>], iteration_bounds = array<i64: 2, 2>, scalar_prefetch = 0 : i64, scratch_operands = 0 : i64, tpu.core_type = #tpu.core_type<tc>, window_params = [{transform_indices = @transform_0, window_bounds = array<i64: 1, 8, 128>}, {transform_indices = @transform_1, window_bounds = array<i64: 1, 16, 128>}, {pipeline_mode = #tpu.pipeline_mode<synchronous>, transform_indices = @transform_2, window_bounds = array<i64: 8, 8>}, {pipeline_mode = #tpu.pipeline_mode<synchronous>, transform_indices = @transform_3, window_bounds = array<i64: 8, 16>}, {pipeline_mode = #tpu.pipeline_mode<synchronous>, transform_indices = @transform_4, window_bounds = array<i64: 8, 8>}, {transform_indices = @transform_5, window_bounds = array<i64: 1, 8, 128>}]} {
    %c0 = arith.constant 0 : index
    %c0_0 = arith.constant 0 : index
    %c0_1 = arith.constant 0 : index
    %0 = vector.load %arg2[%c0, %c0_0, %c0_1] : memref<1x8x128xf32, #tpu.memory_space<vmem>>, vector<1x8x128xf32>
    %1 = vector.shape_cast %0 : vector<1x8x128xf32> to vector<8x128xf32>
    %c0_2 = arith.constant 0 : index
    %c0_3 = arith.constant 0 : index
    %c0_4 = arith.constant 0 : index
    %2 = vector.load %arg3[%c0_2, %c0_3, %c0_4] : memref<1x16x128xf32, #tpu.memory_space<vmem>>, vector<1x16x128xf32>
    %3 = vector.shape_cast %2 : vector<1x16x128xf32> to vector<16x128xf32>
    %c0_5 = arith.constant 0 : index
    %c0_6 = arith.constant 0 : index
    %4 = vector.load %arg4[%c0_5, %c0_6] : memref<8x8xf32, #tpu.memory_space<vmem>>, vector<8x8xf32>
    %cst = arith.constant dense<0.000000e+00> : vector<8x128xf32>
    %5 = tpu.matmul %4, %1, %cst {dimension_numbers = #tpu.dot_dimension_numbers<[1], [0], [0], [1], [0, 0, 1, 1], [], []>} : vector<8x8xf32>, vector<8x128xf32>, vector<8x128xf32> -> vector<8x128xf32>
    %c0_7 = arith.constant 0 : index
    %c0_8 = arith.constant 0 : index
    %6 = vector.load %arg5[%c0_7, %c0_8] : memref<8x16xf32, #tpu.memory_space<vmem>>, vector<8x16xf32>
    %cst_9 = arith.constant dense<0.000000e+00> : vector<8x128xf32>
    %7 = tpu.matmul %6, %3, %cst_9 {dimension_numbers = #tpu.dot_dimension_numbers<[1], [0], [0], [1], [0, 0, 1, 1], [], []>} : vector<8x16xf32>, vector<16x128xf32>, vector<8x128xf32> -> vector<8x128xf32>
    %8 = arith.addf %5, %7 : vector<8x128xf32>
    %cst_10 = arith.constant 0.000000e+00 : f32
    %9 = vector.broadcast %cst_10 : f32 to vector<8x128xf32>
    %10 = arith.maximumf %8, %9 : vector<8x128xf32>
    %c0_11 = arith.constant 0 : index
    %c0_12 = arith.constant 0 : index
    %11 = vector.load %arg6[%c0_11, %c0_12] : memref<8x8xf32, #tpu.memory_space<vmem>>, vector<8x8xf32>
    %cst_13 = arith.constant dense<0.000000e+00> : vector<8x128xf32>
    %12 = tpu.matmul %11, %10, %cst_13 {dimension_numbers = #tpu.dot_dimension_numbers<[1], [0], [0], [1], [0, 0, 1, 1], [], []>} : vector<8x8xf32>, vector<8x128xf32>, vector<8x128xf32> -> vector<8x128xf32>
    %cst_14 = arith.constant 0.000000e+00 : f32
    %13 = vector.broadcast %cst_14 : f32 to vector<8x128xf32>
    %14 = arith.subf %13, %12 : vector<8x128xf32>
    %15 = math.exp %14 : vector<8x128xf32>
    %cst_15 = arith.constant 1.000000e+00 : f32
    %16 = vector.broadcast %cst_15 : f32 to vector<8x128xf32>
    %17 = arith.addf %16, %15 : vector<8x128xf32>
    %18 = tpu.reciprocal %17 : vector<8x128xf32> -> vector<8x128xf32>
    %19 = arith.mulf %1, %18 : vector<8x128xf32>
    %c0_16 = arith.constant 0 : index
    %c0_17 = arith.constant 0 : index
    %c0_18 = arith.constant 0 : index
    %20 = vector.load %arg7[%c0_16, %c0_17, %c0_18] : memref<1x8x128xf32, #tpu.memory_space<vmem>>, vector<1x8x128xf32>
    %21 = vector.shape_cast %20 : vector<1x8x128xf32> to vector<8x128xf32>
    %22 = vector.shape_cast %19 : vector<8x128xf32> to vector<1x8x128xf32>
    tpu.vector_store %arg7[%c0_16, %c0_17, %c0_18], %22 {strides = array<i32>} : memref<1x8x128xf32, #tpu.memory_space<vmem>>, vector<1x8x128xf32>,
    return
  }
  func.func @transform_0(%arg0: i32, %arg1: i32) -> (i32, i32, i32) {
    %c0_i32 = arith.constant 0 : i32
    %c0_i32_0 = arith.constant 0 : i32
    return %arg0, %c0_i32, %arg1 : i32, i32, i32
  }
  func.func @transform_1(%arg0: i32, %arg1: i32) -> (i32, i32, i32) {
    %c0_i32 = arith.constant 0 : i32
    %c0_i32_0 = arith.constant 0 : i32
    return %arg0, %c0_i32, %arg1 : i32, i32, i32
  }
  func.func @transform_2(%arg0: i32, %arg1: i32) -> (i32, i32) {
    %c0_i32 = arith.constant 0 : i32
    %c0_i32_0 = arith.constant 0 : i32
    %c0_i32_1 = arith.constant 0 : i32
    return %c0_i32, %c0_i32_0 : i32, i32
  }
  func.func @transform_3(%arg0: i32, %arg1: i32) -> (i32, i32) {
    %c0_i32 = arith.constant 0 : i32
    %c0_i32_0 = arith.constant 0 : i32
    %c0_i32_1 = arith.constant 0 : i32
    return %c0_i32, %c0_i32_0 : i32, i32
  }
  func.func @transform_4(%arg0: i32, %arg1: i32) -> (i32, i32) {
    %c0_i32 = arith.constant 0 : i32
    %c0_i32_0 = arith.constant 0 : i32
    %c0_i32_1 = arith.constant 0 : i32
    return %c0_i32, %c0_i32_0 : i32, i32
  }
  func.func @transform_5(%arg0: i32, %arg1: i32) -> (i32, i32, i32) {
    %c0_i32 = arith.constant 0 : i32
    %c0_i32_0 = arith.constant 0 : i32
    return %arg0, %c0_i32, %arg1 : i32, i32, i32
  }
}

</mosaic_0001>

<bundles_post_ra>
// kernel: tpu_custom_call.1
= control target key start
LH: loop header
LB: loop body
LE: loop exit
PB: predicated region body
PF: predicated region fallthrough
CT: control target
= control target key end

     0   :  { %s1254_s0 = inlined_call_operand.hbm [shape: f32[2,8,256], index: 0, kind: input, shape index: {}]   ;;  %s1255_s1 = inlined_call_operand.hbm [shape: f32[2,16,256], index: 1, kind: input, shape index: {}]   ;;  %s1256_s2 = inlined_call_operand.hbm [shape: f32[8,8], index: 2, kind: input, shape index: {}]   ;;  %s1257_s3 = inlined_call_operand.hbm [shape: f32[8,16], index: 3, kind: input, shape index: {}]   ;;  %s1258_s4 = inlined_call_operand.hbm [shape: f32[8,8], index: 4, kind: input, shape index: {}]   ;;  %s1259_s5 = inlined_call_operand.hbm [shape: f32[2,8,256], index: 5, kind: output, shape index: {}]  }
   0x1   :  { %1265 = sst [smem:[#allocation23_spill]] %s1254_s0 }
   0x2   :  { %1266 = sst [smem:[#allocation24_spill]] %s1256_s2 }
   0x3   :  { %1267 = sst [smem:[#allocation25_spill]] %s1257_s3 }
   0x4   :  { %1268 = sst [smem:[#allocation26_spill]] %s1258_s4 }
   0x5   :  { %10 = vsyncpa [#allocation3], 0 }
   0x6   :  { %12 = vsyncpa [#allocation3 + $0x1], 0 }
   0x7   :  { %13 = vsyncpa [#allocation6], 0 }
   0x8   :  { %15 = vsyncpa [#allocation6 + $0x1], 0 }
   0x9   :  { %16 = vsyncpa [#allocation9], 0 }
   0xa   :  { %17 = vsyncpa [#allocation4], 0 }
   0xb   :  { %19 = vsyncpa [#allocation4 + $0x1], 0  ;;  %s1049_s18 = smov 0   ;;  %s1051_s19 = smov 0  }
   0xc   :  { %s1053_s20 = smov 0   ;;  %s1055_s21 = smov 0  }
   0xd   :  { %s1057_s22 = smov 0   ;;  %s1059_s23 = smov 0  }
   0xe   :  { %s1061_s24 = smov 0   ;;  %s1063_s25 = smov 0  }
   0xf LB: > { %1269 = sst [smem:[#allocation17_spill]] %s983_s18  ;;  %s1090_s26 = sadd.s32 4294967295, %s1011_s25   ;;  %s1011_s25 = sphi %s1063_s25, %s25_s25   ;;  %s1007_s24 = sphi %s1061_s24, %s1296_s24   ;;  %s1003_s23 = sphi %s1059_s23, %s1295_s23   ;;  %s999_s22 = sphi %s1057_s22, %s1294_s22   ;;  %s995_s21 = sphi %s1055_s21, %s1293_s21   ;;  %s991_s20 = sphi %s1053_s20, %s1288_s20   ;;  %s987_s19 = sphi %s1051_s19, %s1292_s19   ;;  %s983_s18 = sphi %s1049_s18, %s1291_s18  }
  0x10   : > { %1270 = sst [smem:[#allocation18_spill]] %s991_s20  ;;  %s603_s27 = sadd.s32 4294967294, %s1011_s25  }
  0x11   : > { %p59_p0 = scmp.ne.s32.totalorder %s987_s19, %s983_s18  ;;  %p60_p1 = scmp.eq.s32.totalorder %s1090_s26, 0 }
  0x12   : > { %p176_p2 = scmp.eq.s32.totalorder %s1090_s26, 3  ;;  %p182_p3 = scmp.eq.s32.totalorder %s603_s27, 3 }
  0x13   : > { %p1099_p4 = por %p60_p1, %p59_p0  ;;  %p604_p5 = scmp.ge.s32.totalorder %s1011_s25, 1 }
  0x14   : > { %p1104_p6 = por %p182_p3, %p59_p0  ;;  %p189_p7 = scmp.lt.s32.totalorder %s1011_s25, 5 }
  0x15   : > { %s1274_s2 = sld [smem:[#allocation24_spill]]  ;;  %s1013_s9 = smov [#allocation7]  }
  0x16   : > { %s1272_s29 = scalar_select %p1104_p6, 1, 0 }
  0x17   : > { %p1112_p8 = pnand %p604_p5, %p189_p7  ;;  %s203_s10 = sshll.u32 %s1013_s9, 4  ;;  %s204_s10 = int_to_ptr.vmem [resolvable:$true] %s203_s10 }
  0x18   : > { %1273 = sst [smem:[#allocation19_spill]] %s1272_s29  ;;  %s1014_s17 = smov [#allocation8]  }
  0x19   : > { %p648_p9 = pneg %p1112_p8  ;;  %s1276_s3 = sld [smem:[#allocation25_spill]] }
  0x1a   : > { %s1277_s4 = sld [smem:[#allocation26_spill]]  ;;  %s215_s27 = sshll.u32 %s1014_s17, 4  ;;  %s216_s27 = int_to_ptr.vmem [resolvable:$true] %s215_s27 }
  0x1b   : > { %s201_s7 = sshll.u32 %s1274_s2, 4  ;;  %p649_p10 = pnand %p648_p9, %p60_p1  ;;  %s202_s7 = int_to_ptr.hbm [resolvable:$true] %s201_s7 }
  0x1c   : > { %s1015_s30 = smov [#allocation10]   ;;  %s34_s9 = sadd.s32 1, %s1003_s23 }
  0x1d   : > { %651 = dma.hbm_to_vmem [thread:$0]  (!%p649_p10), %s202_s7, 128, %s204_s10, [#allocation6]  }
  0x1e   : > { %s227_s6 = sshll.u32 %s1015_s30, 4  ;;  %p35_p11 = scmp.ge.s32.totalorder %s34_s9, 2  ;;  %s228_s6 = int_to_ptr.vmem [resolvable:$true] %s227_s6 }
  0x1f   : > { %s213_s13 = sshll.u32 %s1276_s3, 4  ;;  %s37_s11 = sadd.s32 1, %s1007_s24  ;;  %s214_s13 = int_to_ptr.hbm [resolvable:$true] %s213_s13 }
  0x20   : > { %s225_s16 = sshll.u32 %s1277_s4, 4  ;;  %s46_s12 = sadd.s32 1, %s991_s20  ;;  %s226_s16 = int_to_ptr.hbm [resolvable:$true] %s225_s16 }
  0x21   : > { %654 = dma.hbm_to_vmem [thread:$0]  (!%p649_p10), %s214_s13, 128, %s216_s27, [#allocation9]  }
  0x22   : > { %657 = dma.hbm_to_vmem [thread:$0]  (!%p649_p10), %s226_s16, 128, %s228_s6, [#allocation9]  }
  0x23   : > { %p53_p12 = scmp.ne.s32.totalorder %s991_s20, %s987_s19  ;;  %s1298_s9 = smov (%p35_p11, %s34_s9), 0 }
  0x24   : > { %1278 = sst [smem:[#allocation20_spill]] %s1298_s9  ;;  %s1300_s11 = smov (!%p35_p11, %s37_s11), %s1007_s24 }
  0x25   : > { %s42_s7 = ssub.s32 %s1003_s23, %s1298_s9  ;;  %p54_p13 = scmp.eq.s32.totalorder %s1011_s25, 0 }
  0x26   : > { %p39_p0 = scmp.ge.s32.totalorder %s1300_s11, 2  ;;  %p1139_p3 = por %p176_p2, %p53_p12 }
  0x27   : > { %p1143_p5 = por %p54_p13, %p53_p12  ;;  %p672_p7 = scmp.lt.s32.totalorder %s1011_s25, 4 }
  0x28   : > { %s1302_s11 = smov (%p39_p0, %s1300_s11), 0  ;;  %s238_s14 = sand.u32 1, %s991_s20  }
  0x29   : > { %1281 = sst [smem:[#allocation21_spill]] %s1302_s11  ;;  %s610_s15 = sshll.u32 %s1007_s24, 1 }
  0x2a   : > { %s41_s16 = ssub.s32 %s1007_s24, %s1302_s11  ;;  %s609_s27 = sshll.u32 %s238_s14, 3 }
  0x2b   : > { %s43_s17 = sor.u32 %s42_s7, %s41_s16  ;;  %s246_s30 = sadd.s32 %s1003_s23, %s610_s15 }
  0x2c   : > { %p44_p2 = scmp.eq.s32.totalorder %s43_s17, 0  ;;  %s242_s6 = scalar_lea.vmem [#allocation2], %s609_s27 }
  0x2d   : > { %s252_s2 = sshll.u32 %s242_s6, 4  ;;  %s611_s4 = sshll.u32 %s246_s30, 3  ;;  %s253_s2 = int_to_ptr.vmem [resolvable:$true] %s252_s2 }
  0x2e   : > { %s1156_s3 = scalar_select %p44_p2, %s991_s20, %s46_s12  }
  0x2f   : > { %s1283_s0 = sld [smem:[#allocation23_spill]]  ;;  %p1165_p9 = pnand %p672_p7, %p1143_p5 }
  0x30   : > { %1282 = sst [smem:[#allocation22_spill]] %s1156_s3  ;;  %s612_s15 = sshll.u32 %s238_s14, 4 }
  0x31   : > { %s239_s17 = scalar_lea.sflag [#allocation3], %s238_s14  ;;  %s613_s12 = sshll.u32 %s1007_s24, 2 }
  0x32   : > { %s267_s27 = sadd.s32 %s1003_s23, %s613_s12  ;;  %s263_s30 = scalar_lea.vmem [#allocation5], %s612_s15 }
  0x33   : > { %s272_s6 = sshll.u32 %s263_s30, 4  ;;  %s614_s29 = sshll.u32 %s267_s27, 3  ;;  %s273_s6 = int_to_ptr.vmem [resolvable:$true] %s272_s6 }
  0x34   : > { %s269_s13 = scalar_lea.hbm %s1255_s1, %s614_s29  ;;  %s1016_s3 = smov 256  }
  0x35   : > { %s248_s18 = scalar_lea.hbm %s1283_s0, %s611_s4  ;;  %s259_s0 = sand.u32 1, %s1011_s25  }
  0x36   : > { %s250_s16 = sshll.u32 %s248_s18, 4  ;;  %s270_s11 = sshll.u32 %s269_s13, 4  ;;  %s251_s16 = int_to_ptr.hbm [resolvable:$true] %s250_s16  ;;  %s271_s11 = int_to_ptr.hbm [resolvable:$true] %s270_s11 }
  0x37   : > { %661 = dma.hbm_to_vmem [thread:$0]  (!%p1165_p9), %s251_s16, 128, %s253_s2, %s239_s17  }
  0x38   : > { %s260_s18 = scalar_lea.sflag [#allocation6], %s259_s0  ;;  %s1017_s20 = smov 128  }
  0x39   : > { %s1018_s14 = smov 8   ;;  %284 = sbr.rel (%p1112_p8) target bundleno = 372 (0x174), region = 40 }
  0x3a   : > { %664 = dma.hbm_to_vmem [thread:$0]  (!%p1165_p9), %s271_s11, 256, %s273_s6, %s260_s18, %s1016_s3, %s1017_s20, %s1018_s14  }
  0x3b   : > { %s1182_s2 = sand.u32 (!%p1112_p8), 1, %s987_s19  }
  0x3c   : > { %s616_s16 = sshll.u32 (!%p1112_p8), %s1182_s2, 3  ;;  %s287_s15 = scalar_lea.sflag (!%p1112_p8), [#allocation3], %s1182_s2 }
  0x3d   : > { %s290_s17 = scalar_lea.vmem (!%p1112_p8), [#allocation2], %s616_s16 }
  0x3e   : > { %962 = dma.done.wait (%p1099_p4), %s287_s15, 128  }
  0x3f   : > { %964 = vsyncadd (%p1099_p4), %s287_s15, 4294967168  ;;  %s296_s0 = sand.u32 1, %s1090_s26   ;;  %s617_s3 = sshll.u32 %s1182_s2, 4 }
  0x40   : > { %s297_s20 = scalar_lea.sflag [#allocation6], %s296_s0  ;;  %s300_s8 = scalar_lea.vmem [#allocation5], %s617_s3 }
  0x41   : > { %966 = dma.done.wait (%p1099_p4), %s297_s20, 256  }
  0x42   : > { %968 = vsyncadd (%p1099_p4), %s297_s20, 4294967040 }
  0x43   : > { %970 = dma.done.wait (%p60_p1), [#allocation6], 128  }
  0x44   : > { %972 = vsyncadd (%p60_p1), [#allocation6], 4294967168 }
  0x45   : > { %974 = dma.done.wait (%p60_p1), [#allocation9], 256  }
  0x46   : > { %976 = vsyncadd (%p60_p1), [#allocation9], 4294967040  ;;  %vm377_vm0 = vcmask 64512   ;;  %v350_v0 = vld [vmem:[%s300_s8 + $0x8] sm:$0xff]  ;;  %v349_v1 = vld [vmem:[%s300_s8] sm:$0xff]  ;;  %vm353_vm1 = vcmask 130048  }
  0x47   : > { %v348_v2 = vld [vmem:[%s290_s17] sm:$0xff]  ;;  %371 = vmatpush.msra.mxu0 %v350_v0  ;;  %v352_v3 = vld [vmem:[#allocation8] sm:$0xff]  ;;  %v351_v4 = vld [vmem:[#allocation7] sm:$0xff]  ;;  %s626_s26 = sshll.u32 %s999_s22, 1  ;;  %s447_s6 = scalar_lea.sflag [#allocation4], %s1182_s2 }
  0x48   : > { %396 = vmatpush.msra.mxu1 %v348_v2  ;;  %v402_v9 = vld [vmem:[#allocation10] sm:$0xff]  ;;  %s457_s28 = sadd.s32 %s995_s21, %s626_s26  ;;  %s347_s21 = scalar_lea.vmem [#allocation11], %s616_s16 }
  0x49   : > { %623 = vmatmul.msk.f32.vlgmr.msra.gmra.mxu1 %vm377_vm0, %v351_v4  ;;  %372 = vmatpush.msra.mxu0 %v349_v1  ;;  %s627_s11 = sshll.u32 %s457_s28, 3  ;;  %s461_s22 = sshll.u32 %s347_s21, 4  ;;  %s462_s22 = int_to_ptr.vmem [resolvable:$true] %s461_s22 }
  0x4a   : > { %622 = vmatmul.msk.f32.vlgmr.msra.gmra.mxu0 %vm353_vm1, %v352_v3  ;;  %s459_s27 = scalar_lea.hbm %s1259_s5, %s627_s11  ;;  %s921_s18 = scalar_lea.hbm %s1259_s5, 32 }
  0x4b   : > { %s463_s30 = sshll.u32 %s459_s27, 4  ;;  %s464_s30 = int_to_ptr.hbm [resolvable:$true] %s463_s30 }
  0x4c   : > { %s915_s29 = sshra.s32 %s464_s30, 4  ;;  %s916_s29 = int_to_ptr.hbm [resolvable:$true] %s915_s29 }
  0x4d   : > { %s917_s4 = scalar_lea.hbm %s916_s29, 8  ;;  %p922_p10 = scmp.lt.s32.totalorder %s916_s29, %s1259_s5 }
  0x4e   : > { %p918_p1 = scmp.ne.s32.totalorder %s916_s29, %s917_s4  ;;  %p923_p11 = scmp.lt.s32.totalorder %s921_s18, %s917_s4 }
  0x50   : > { %p919_p4 = pnand %p918_p1, %p1139_p3  ;;  %p924_p12 = por %p923_p11, %p922_p10 }
  0x52   : > { %p920_p8 = pneg %p919_p4 }
  0x54   : > { %p925_p13 = pnand %p924_p12, %p920_p8 }
  0xc6   : > { %v398_v5 = vpop.f32.mrf.mxu1 }
  0xc7   : > { %v374_v6 = vpop.f32.mrf.mxu0 }
  0xc8   : > { %v399_v7 = vadd.f32 %v398_v5, %v374_v6 }
  0xca   : > { %v401_v8 = vmax.f32 %v399_v7, 0.0 }
  0xcc   : > { %421 = vmatpush.msra.mxu2 %v401_v8 }
  0xcd   : > { %624 = vmatmul.msk.f32.vlgmr.msra.gmra.mxu2 %vm377_vm0, %v402_v9 }
 0x150   : > { %v423_v10 = vpop.f32.mrf.mxu2 }
 0x151   : > { %v426_v11 = vsub.f32 0.0, %v423_v10 }
 0x153   : > { %v427_v12 = vmul.f32 1.442695, %v426_v11 }
 0x155   : > { %747 = vpow2.f32 %v427_v12 }
 0x15b   : > { %v748_v13 = vpop.eup %747 }
 0x15c   : > { %v429_v14 = vadd.f32 1.0, %v748_v13 }
 0x15e   : > { %749 = vrcp.f32 %v429_v14  ;;  %v441_v18 = vand.u32 2147483648, %v429_v14  ;;  %v439_v20 = vand.u32 2147483647, %v429_v14  ;;  %vm435_vm3 = vweird.f32 %v429_v14 }
 0x160   : > { %v442_v22 = vor.u32 1.1754944e-38, %v441_v18  ;;  %vm440_vm5 = vcmp.eq.f32.partialorder %v439_v20, 8.507059e+37 }
 0x164   : > { %v750_v15 = vpop.eup %749 }
 0x165   : > { %v431_v16 = vmul.f32 %v750_v15, %v429_v14  ;;  %vm436_vm2 = vweird.f32 %v750_v15 }
 0x166   : > { %vm437_vm4 = vmor %vm435_vm3, %vm436_vm2 }
 0x167   : > { %v432_v17 = vsub.f32 1.0, %v431_v16 }
 0x169   : > { %v433_v19 = vmul.f32 %v750_v15, %v432_v17 }
 0x16b   : > { %v434_v21 = vadd.f32 %v750_v15, %v433_v19 }
 0x16d   : > { %v438_v23 = vsel %vm437_vm4, %v750_v15, %v434_v21 }
 0x16e   : > { %v443_v24 = vsel %vm440_vm5, %v442_v22, %v438_v23 }
 0x16f   : > { %v444_v25 = vmul.f32 %v443_v24, %v348_v2 }
 0x171   : > { %445 = vst [vmem:[%s347_s21] sm:$0xff] %v444_v25 }
 0x172   : > { %928 = shalt.err (!%p925_p13)
}
 0x173   : > { %646 = dma.vmem_to_hbm [thread:$0]  (%p1139_p3), %s462_s22, 128, %s464_s30, %s447_s6  }
 0x174 PF: > { %s1285_s2 = sld [smem:[#allocation17_spill]]  ;;  %p676_p0 = scmp.ge.s32.totalorder %s1011_s25, 2 }
 0x176   : > { %p666_p5 = pnand %p676_p0, %p1104_p6 }
 0x178   : > { %p667_p7 = pneg %p666_p5 }
 0x17a   : > { %s475_s17 = sand.u32 1, %s1285_s2  }
 0x17b   : > { %s476_s0 = scalar_lea.sflag [#allocation4], %s475_s17 }
 0x17c   : > { %978 = dma.done.wait (%p667_p7), %s476_s0, 128  }
 0x17d   : > { %980 = vsyncadd (%p667_p7), %s476_s0, 4294967168  ;;  %s25_s25 = sadd.s32 1, %s1011_s25   ;;  %s1287_s3 = sld [smem:[#allocation18_spill]] }
 0x17e   : > { %p22_p2 = scmp.ge.s32.totalorder %s25_s25, 6   ;;  %s1288_s20 = sld [smem:[#allocation22_spill]] }
 0x17f   : > { %s1289_s10 = sld [smem:[#allocation20_spill]]  ;;  %s1291_s18 = smov %s987_s19 }
 0x180   : > { %s1290_s8 = sld [smem:[#allocation21_spill]]  ;;  %s1293_s21 = smov %s1003_s23 }
 0x181   : > { %s1294_s22 = smov %s1007_s24 }
 0x182   :  { %24 = sbr.rel (!%p22_p2) target bundleno = 15 (0xf), region = 110 }
 0x183   : > { %s1292_s19 = smov %s1287_s3 }
 0x185   : > { %s1295_s23 = smov %s1289_s10 }
 0x186   : > { %s1296_s24 = smov %s1290_s8 }
 0x187   :  { %482 = vsyncpa [#allocation3], 1 }
 0x188   :  { %484 = vsyncpa [#allocation3 + $0x1], 1 }
 0x189   :  { %485 = vsyncpa [#allocation6], 1 }
 0x18a   :  { %487 = vsyncpa [#allocation6 + $0x1], 1 }
 0x18b   :  { %488 = vsyncpa [#allocation9], 1 }
 0x18c   :  { %489 = vsyncpa [#allocation4], 1 }
 0x18d   :  { %491 = vsyncpa [#allocation4 + $0x1], 1 }

</bundles_post_ra>
